<compile_context>
chip_gen: v6e
topology: v6e:2x2x1
jax: 0.10.0
libtpu: 0.0.40
codegen_flags: <defaults>
</compile_context>

<pallas_src>
import functools

import jax
import jax.numpy as jnp
from jax.experimental import pallas as pl
from jax.experimental.pallas import tpu as pltpu

N_HIDDEN_2 = 256   # input to layer3 (= concat of two 128-wide halves)
N_HIDDEN_3 = 128
N_HIDDEN_4 = 64
N_HIDDEN_5 = 32
OUT_DIM = 2

_LANE = 128        # all hidden layer widths are padded to a multiple of this
_MIN_TB = 16       # bf16 packs 16 rows per vreg sublane group
_MAX_TB = 2048     # large, DMA-friendly batch tile (~2 MB f32 inputs per step)


def _round_up(x, m):
    return ((x + m - 1) // m) * m


def _choose_tb(batch):
    """Batch tile: >=16, <=2048, targets >=4 grid steps, prefers exact division."""
    if batch <= _MIN_TB:
        return _MIN_TB
    steps_target = 4 if batch >= 4 * _MIN_TB else 2
    tb = min(_MAX_TB, _round_up(pl.cdiv(batch, steps_target), _MIN_TB))
    # Prefer a 16-aligned tile that divides B exactly (skips the jnp.pad pass).
    if batch % _MIN_TB == 0 and batch % tb != 0:
        for cand in range(tb, _MIN_TB - 1, -_MIN_TB):
            if batch % cand == 0:
                return cand
    return tb


@functools.lru_cache(maxsize=1)
def _use_bf16_tanh():
    """bf16 EUP exists on v6e / v7x; keep f32 tanh on v5e and older."""
    try:
        kind = jax.devices()[0].device_kind.lower()
    except Exception:
        return False
    return not any(tag in kind for tag in ("v2", "v3", "v4", "v5"))


def _mlp_kernel(x1_ref, x2_ref,
                w3a_ref, w3b_ref, b3_ref,
                w4_ref, b4_ref,
                w5_ref, b5_ref,
                w6_ref, b6_ref,
                out_ref, *, bf16_tanh):
    # In-kernel cast to bf16 (no-op if the caller already supplies bf16).
    x1 = x1_ref[...].astype(jnp.bfloat16)
    x2 = x2_ref[...].astype(jnp.bfloat16)

    def act(z_f32):
        if bf16_tanh:
            return jnp.tanh(z_f32.astype(jnp.bfloat16))       # bf16 EUP path
        return jnp.tanh(z_f32).astype(jnp.bfloat16)            # f32 EUP path (v5e)

    # layer3: split matmul replaces concat([x1, x2], dim=1) @ W3
    z3 = (jnp.dot(x1, w3a_ref[...], preferred_element_type=jnp.float32)
          + jnp.dot(x2, w3b_ref[...], preferred_element_type=jnp.float32)
          + b3_ref[...])                                        # (TB, 128) f32
    h3 = act(z3)

    h4 = act(jnp.dot(h3, w4_ref[...], preferred_element_type=jnp.float32)
             + b4_ref[...])                                     # (TB, 128), cols>=64 are 0
    h5 = act(jnp.dot(h4, w5_ref[...], preferred_element_type=jnp.float32)
             + b5_ref[...])                                     # (TB, 128), cols>=32 are 0

    out = jnp.dot(h5, w6_ref[...], preferred_element_type=jnp.float32) + b6_ref[...]
    out_ref[...] = out.astype(out_ref.dtype)                    # (TB, 2) store


def _pad2(a, rows, cols):
    return jnp.pad(a, ((0, rows - a.shape[0]), (0, cols - a.shape[1])))


@jax.jit
def _forward(x1, x2, w3, b3, w4, b4, w5, b5, w6, b6):
    B, d1 = x1.shape
    d2 = x2.shape[1]
    out_dim = w6.shape[1]

    # Padded (lane-dense) hidden widths; the output stays at its real width.
    H3 = _round_up(w3.shape[1], _LANE)
    H4 = _round_up(w4.shape[1], _LANE)
    H5 = _round_up(w5.shape[1], _LANE)

    tb = _choose_tb(B)
    b_pad = _round_up(B, tb)
    grid = (b_pad // tb,)

    if b_pad != B:   # only pad when the tile does not divide the batch
        x1 = jnp.pad(x1, ((0, b_pad - B), (0, 0)))
        x2 = jnp.pad(x2, ((0, b_pad - B), (0, 0)))

    # Split W3 along the input axis (kills the in-kernel concat); pad hidden
    # dims to 128 lanes; weights bf16, biases f32.  W6/b6 keep the real width.
    w3a = _pad2(w3[:d1], d1, H3).astype(jnp.bfloat16)
    w3b = _pad2(w3[d1:], d2, H3).astype(jnp.bfloat16)
    b3p = _pad2(b3, 1, H3).astype(jnp.float32)
    w4p = _pad2(w4, H3, H4).astype(jnp.bfloat16)
    b4p = _pad2(b4, 1, H4).astype(jnp.float32)
    w5p = _pad2(w5, H4, H5).astype(jnp.bfloat16)
    b5p = _pad2(b5, 1, H5).astype(jnp.float32)
    w6p = _pad2(w6, H5, out_dim).astype(jnp.bfloat16)   # pad only the input dim
    b6p = b6.astype(jnp.float32)                          # (1, out_dim)

    def full_spec(a):
        # Grid-invariant block (constant index_map -> fetched once, not per step).
        return pl.BlockSpec(a.shape, lambda i: (0, 0))

    x_bytes = x1.dtype.itemsize
    weight_elems = d1 * H3 + d2 * H3 + H3 * H4 + H4 * H5 + H5 * out_dim
    cost = pl.CostEstimate(
        flops=2 * b_pad * weight_elems,
        transcendentals=b_pad * (H3 + H4 + H5),
        bytes_accessed=(b_pad * ((d1 + d2) * x_bytes + out_dim * 4)
                        + 2 * weight_elems
                        + 4 * (H3 + H4 + H5 + out_dim)),
    )

    kernel = functools.partial(_mlp_kernel, bf16_tanh=_use_bf16_tanh())

    out = pl.pallas_call(
        kernel,
        out_shape=jax.ShapeDtypeStruct((b_pad, out_dim), jnp.float32),
        grid_spec=pltpu.PrefetchScalarGridSpec(
            num_scalar_prefetch=0,
            grid=grid,
            in_specs=[
                pl.BlockSpec((tb, d1), lambda i: (i, 0)),   # x1 tile (caller dtype)
                pl.BlockSpec((tb, d2), lambda i: (i, 0)),   # x2 tile (caller dtype)
                full_spec(w3a), full_spec(w3b), full_spec(b3p),
                full_spec(w4p), full_spec(b4p),
                full_spec(w5p), full_spec(b5p),
                full_spec(w6p), full_spec(b6p),
            ],
            out_specs=pl.BlockSpec((tb, out_dim), lambda i: (i, 0)),
        ),
        compiler_params=pltpu.CompilerParams(
            dimension_semantics=("parallel",),
        ),
        cost_estimate=cost,
    )(x1, x2, w3a, w3b, b3p, w4p, b4p, w5p, b5p, w6p, b6p)

    if b_pad != B:
        out = out[:B]
    return out


def server_leakyrelu_net_4(x1, x2, params):
    """Pallas forward pass. x1, x2: (B, 128) each; params in (in, out) layout, f32."""
    w3, b3, w4, b4, w5, b5, w6, b6 = params
    return _forward(x1, x2, w3, b3, w4, b4, w5, b5, w6, b6)


def _init_linear(key, fan_in, fan_out):
    """PyTorch nn.Linear default init: U(-1/sqrt(fan_in), 1/sqrt(fan_in)).

    Returns weight already transposed to (fan_in, fan_out) plus bias (1, fan_out)."""
    kw, kb = jax.random.split(key)
    bound = 1.0 / jnp.sqrt(fan_in)
    w = jax.random.uniform(kw, (fan_in, fan_out), jnp.float32, -bound, bound)
    b = jax.random.uniform(kb, (1, fan_out), jnp.float32, -bound, bound)
    return w, b


def _reference(x1, x2, params):
    w3, b3, w4, b4, w5, b5, w6, b6 = params
    x = jnp.concatenate([x1, x2], axis=1)
    h = jnp.tanh(x @ w3 + b3)
    h = jnp.tanh(h @ w4 + b4)
    h = jnp.tanh(h @ w5 + b5)
    return h @ w6 + b6


if __name__ == "__main__":
    key = jax.random.PRNGKey(0)
    k_x1, k_x2, k3, k4, k5, k6 = jax.random.split(key, 6)

    B = 16
    # The two input halves (e.g. client embeddings) concatenated give 256 features.
    x1 = jax.random.normal(k_x1, (B, N_HIDDEN_2 // 2), jnp.float32)
    x2 = jax.random.normal(k_x2, (B, N_HIDDEN_2 // 2), jnp.float32)

    w3, b3 = _init_linear(k3, N_HIDDEN_2, N_HIDDEN_3)
    w4, b4 = _init_linear(k4, N_HIDDEN_3, N_HIDDEN_4)
    w5, b5 = _init_linear(k5, N_HIDDEN_4, N_HIDDEN_5)
    w6, b6 = _init_linear(k6, N_HIDDEN_5, OUT_DIM)
    params = (w3, b3, w4, b4, w5, b5, w6, b6)

    out = server_leakyrelu_net_4(x1, x2, params)
    out = jax.block_until_ready(out)

    ref = _reference(x1, x2, params)
    assert out.shape == (B, OUT_DIM)
    # bf16 weights/activations with f32 accumulation: compare vs the f32 reference
    # with a bf16-appropriate tolerance (tanh is saturating, output magnitudes ~1).
    assert jnp.allclose(out, ref, atol=5e-2, rtol=5e-2), "Pallas output mismatch vs reference"

    # TODO(synk): the PyTorch NaN-check side effect (raise ValueError on NaN in x)
    # is host-side control flow and is not reproduced inside the kernel.
    print("KERNEL_OK")
</pallas_src>

<mosaic_0001>
module attributes {stable_mosaic.version = 11 : i64} {
  func.func @_mlp_kernel(%arg0: i32, %arg1: memref<16x128xf32, #tpu.memory_space<vmem>>, %arg2: memref<16x128xf32, #tpu.memory_space<vmem>>, %arg3: memref<128x128xbf16, #tpu.memory_space<vmem>>, %arg4: memref<128x128xbf16, #tpu.memory_space<vmem>>, %arg5: memref<1x128xf32, #tpu.memory_space<vmem>>, %arg6: memref<128x128xbf16, #tpu.memory_space<vmem>>, %arg7: memref<1x128xf32, #tpu.memory_space<vmem>>, %arg8: memref<128x128xbf16, #tpu.memory_space<vmem>>, %arg9: memref<1x128xf32, #tpu.memory_space<vmem>>, %arg10: memref<128x2xbf16, #tpu.memory_space<vmem>>, %arg11: memref<1x2xf32, #tpu.memory_space<vmem>>, %arg12: memref<16x2xf32, #tpu.memory_space<vmem>>) attributes {dimension_semantics = [#tpu.dimension_semantics<parallel>], iteration_bounds = array<i64: 1>, scalar_prefetch = 0 : i64, scratch_operands = 0 : i64, tpu.core_type = #tpu.core_type<tc>, window_params = [{transform_indices = @transform_0, window_bounds = array<i64: 16, 128>}, {transform_indices = @transform_1, window_bounds = array<i64: 16, 128>}, {pipeline_mode = #tpu.pipeline_mode<synchronous>, transform_indices = @transform_2, window_bounds = array<i64: 128, 128>}, {pipeline_mode = #tpu.pipeline_mode<synchronous>, transform_indices = @transform_3, window_bounds = array<i64: 128, 128>}, {pipeline_mode = #tpu.pipeline_mode<synchronous>, transform_indices = @transform_4, window_bounds = array<i64: 1, 128>}, {pipeline_mode = #tpu.pipeline_mode<synchronous>, transform_indices = @transform_5, window_bounds = array<i64: 128, 128>}, {pipeline_mode = #tpu.pipeline_mode<synchronous>, transform_indices = @transform_6, window_bounds = array<i64: 1, 128>}, {pipeline_mode = #tpu.pipeline_mode<synchronous>, transform_indices = @transform_7, window_bounds = array<i64: 128, 128>}, {pipeline_mode = #tpu.pipeline_mode<synchronous>, transform_indices = @transform_8, window_bounds = array<i64: 1, 128>}, {pipeline_mode = #tpu.pipeline_mode<synchronous>, transform_indices = @transform_9, window_bounds = array<i64: 128, 2>}, {pipeline_mode = #tpu.pipeline_mode<synchronous>, transform_indices = @transform_10, window_bounds = array<i64: 1, 2>}, {transform_indices = @transform_11, window_bounds = array<i64: 16, 2>}]} {
    %c0 = arith.constant 0 : index
    %c0_0 = arith.constant 0 : index
    %0 = vector.load %arg1[%c0, %c0_0] : memref<16x128xf32, #tpu.memory_space<vmem>>, vector<16x128xf32>
    %1 = arith.truncf %0 : vector<16x128xf32> to vector<16x128xbf16>
    %c0_1 = arith.constant 0 : index
    %c0_2 = arith.constant 0 : index
    %2 = vector.load %arg2[%c0_1, %c0_2] : memref<16x128xf32, #tpu.memory_space<vmem>>, vector<16x128xf32>
    %3 = arith.truncf %2 : vector<16x128xf32> to vector<16x128xbf16>
    %c0_3 = arith.constant 0 : index
    %c0_4 = arith.constant 0 : index
    %4 = vector.load %arg3[%c0_3, %c0_4] : memref<128x128xbf16, #tpu.memory_space<vmem>>, vector<128x128xbf16>
    %cst = arith.constant dense<0.000000e+00> : vector<16x128xf32>
    %5 = tpu.matmul %1, %4, %cst {dimension_numbers = #tpu.dot_dimension_numbers<[1], [0], [0], [1], [0, 0, 1, 1], [], []>} : vector<16x128xbf16>, vector<128x128xbf16>, vector<16x128xf32> -> vector<16x128xf32>
    %c0_5 = arith.constant 0 : index
    %c0_6 = arith.constant 0 : index
    %6 = vector.load %arg4[%c0_5, %c0_6] : memref<128x128xbf16, #tpu.memory_space<vmem>>, vector<128x128xbf16>
    %cst_7 = arith.constant dense<0.000000e+00> : vector<16x128xf32>
    %7 = tpu.matmul %3, %6, %cst_7 {dimension_numbers = #tpu.dot_dimension_numbers<[1], [0], [0], [1], [0, 0, 1, 1], [], []>} : vector<16x128xbf16>, vector<128x128xbf16>, vector<16x128xf32> -> vector<16x128xf32>
    %8 = arith.addf %5, %7 : vector<16x128xf32>
    %c0_8 = arith.constant 0 : index
    %c0_9 = arith.constant 0 : index
    %9 = vector.load %arg5[%c0_8, %c0_9] : memref<1x128xf32, #tpu.memory_space<vmem>>, vector<1x128xf32>
    %10 = vector.broadcast %9 : vector<1x128xf32> to vector<16x128xf32>
    %11 = arith.addf %8, %10 : vector<16x128xf32>
    %12 = arith.truncf %11 : vector<16x128xf32> to vector<16x128xbf16>
    %13 = math.tanh %12 : vector<16x128xbf16>
    %c0_10 = arith.constant 0 : index
    %c0_11 = arith.constant 0 : index
    %14 = vector.load %arg6[%c0_10, %c0_11] : memref<128x128xbf16, #tpu.memory_space<vmem>>, vector<128x128xbf16>
    %cst_12 = arith.constant dense<0.000000e+00> : vector<16x128xf32>
    %15 = tpu.matmul %13, %14, %cst_12 {dimension_numbers = #tpu.dot_dimension_numbers<[1], [0], [0], [1], [0, 0, 1, 1], [], []>} : vector<16x128xbf16>, vector<128x128xbf16>, vector<16x128xf32> -> vector<16x128xf32>
    %c0_13 = arith.constant 0 : index
    %c0_14 = arith.constant 0 : index
    %16 = vector.load %arg7[%c0_13, %c0_14] : memref<1x128xf32, #tpu.memory_space<vmem>>, vector<1x128xf32>
    %17 = vector.broadcast %16 : vector<1x128xf32> to vector<16x128xf32>
    %18 = arith.addf %15, %17 : vector<16x128xf32>
    %19 = arith.truncf %18 : vector<16x128xf32> to vector<16x128xbf16>
    %20 = math.tanh %19 : vector<16x128xbf16>
    %c0_15 = arith.constant 0 : index
    %c0_16 = arith.constant 0 : index
    %21 = vector.load %arg8[%c0_15, %c0_16] : memref<128x128xbf16, #tpu.memory_space<vmem>>, vector<128x128xbf16>
    %cst_17 = arith.constant dense<0.000000e+00> : vector<16x128xf32>
    %22 = tpu.matmul %20, %21, %cst_17 {dimension_numbers = #tpu.dot_dimension_numbers<[1], [0], [0], [1], [0, 0, 1, 1], [], []>} : vector<16x128xbf16>, vector<128x128xbf16>, vector<16x128xf32> -> vector<16x128xf32>
    %c0_18 = arith.constant 0 : index
    %c0_19 = arith.constant 0 : index
    %23 = vector.load %arg9[%c0_18, %c0_19] : memref<1x128xf32, #tpu.memory_space<vmem>>, vector<1x128xf32>
    %24 = vector.broadcast %23 : vector<1x128xf32> to vector<16x128xf32>
    %25 = arith.addf %22, %24 : vector<16x128xf32>
    %26 = arith.truncf %25 : vector<16x128xf32> to vector<16x128xbf16>
    %27 = math.tanh %26 : vector<16x128xbf16>
    %c0_20 = arith.constant 0 : index
    %c0_21 = arith.constant 0 : index
    %28 = vector.load %arg10[%c0_20, %c0_21] : memref<128x2xbf16, #tpu.memory_space<vmem>>, vector<128x2xbf16>
    %cst_22 = arith.constant dense<0.000000e+00> : vector<16x2xf32>
    %29 = tpu.matmul %27, %28, %cst_22 {dimension_numbers = #tpu.dot_dimension_numbers<[1], [0], [0], [1], [0, 0, 1, 1], [], []>} : vector<16x128xbf16>, vector<128x2xbf16>, vector<16x2xf32> -> vector<16x2xf32>
    %c0_23 = arith.constant 0 : index
    %c0_24 = arith.constant 0 : index
    %30 = vector.load %arg11[%c0_23, %c0_24] : memref<1x2xf32, #tpu.memory_space<vmem>>, vector<1x2xf32>
    %31 = vector.broadcast %30 : vector<1x2xf32> to vector<16x2xf32>
    %32 = arith.addf %29, %31 : vector<16x2xf32>
    %c0_25 = arith.constant 0 : index
    %c0_26 = arith.constant 0 : index
    %33 = vector.load %arg12[%c0_25, %c0_26] : memref<16x2xf32, #tpu.memory_space<vmem>>, vector<16x2xf32>
    tpu.vector_store %arg12[%c0_25, %c0_26], %32 {strides = array<i32>} : memref<16x2xf32, #tpu.memory_space<vmem>>, vector<16x2xf32>,
    return
  }
  func.func @transform_0(%arg0: i32) -> (i32, i32) {
    %c0_i32 = arith.constant 0 : i32
    %c0_i32_0 = arith.constant 0 : i32
    return %arg0, %c0_i32 : i32, i32
  }
  func.func @transform_1(%arg0: i32) -> (i32, i32) {
    %c0_i32 = arith.constant 0 : i32
    %c0_i32_0 = arith.constant 0 : i32
    return %arg0, %c0_i32 : i32, i32
  }
  func.func @transform_2(%arg0: i32) -> (i32, i32) {
    %c0_i32 = arith.constant 0 : i32
    %c0_i32_0 = arith.constant 0 : i32
    %c0_i32_1 = arith.constant 0 : i32
    return %c0_i32, %c0_i32_0 : i32, i32
  }
  func.func @transform_3(%arg0: i32) -> (i32, i32) {
    %c0_i32 = arith.constant 0 : i32
    %c0_i32_0 = arith.constant 0 : i32
    %c0_i32_1 = arith.constant 0 : i32
    return %c0_i32, %c0_i32_0 : i32, i32
  }
  func.func @transform_4(%arg0: i32) -> (i32, i32) {
    %c0_i32 = arith.constant 0 : i32
    %c0_i32_0 = arith.constant 0 : i32
    %c0_i32_1 = arith.constant 0 : i32
    return %c0_i32, %c0_i32_0 : i32, i32
  }
  func.func @transform_5(%arg0: i32) -> (i32, i32) {
    %c0_i32 = arith.constant 0 : i32
    %c0_i32_0 = arith.constant 0 : i32
    %c0_i32_1 = arith.constant 0 : i32
    return %c0_i32, %c0_i32_0 : i32, i32
  }
  func.func @transform_6(%arg0: i32) -> (i32, i32) {
    %c0_i32 = arith.constant 0 : i32
    %c0_i32_0 = arith.constant 0 : i32
    %c0_i32_1 = arith.constant 0 : i32
    return %c0_i32, %c0_i32_0 : i32, i32
  }
  func.func @transform_7(%arg0: i32) -> (i32, i32) {
    %c0_i32 = arith.constant 0 : i32
    %c0_i32_0 = arith.constant 0 : i32
    %c0_i32_1 = arith.constant 0 : i32
    return %c0_i32, %c0_i32_0 : i32, i32
  }
  func.func @transform_8(%arg0: i32) -> (i32, i32) {
    %c0_i32 = arith.constant 0 : i32
    %c0_i32_0 = arith.constant 0 : i32
    %c0_i32_1 = arith.constant 0 : i32
    return %c0_i32, %c0_i32_0 : i32, i32
  }
  func.func @transform_9(%arg0: i32) -> (i32, i32) {
    %c0_i32 = arith.constant 0 : i32
    %c0_i32_0 = arith.constant 0 : i32
    %c0_i32_1 = arith.constant 0 : i32
    return %c0_i32, %c0_i32_0 : i32, i32
  }
  func.func @transform_10(%arg0: i32) -> (i32, i32) {
    %c0_i32 = arith.constant 0 : i32
    %c0_i32_0 = arith.constant 0 : i32
    %c0_i32_1 = arith.constant 0 : i32
    return %c0_i32, %c0_i32_0 : i32, i32
  }
  func.func @transform_11(%arg0: i32) -> (i32, i32) {
    %c0_i32 = arith.constant 0 : i32
    %c0_i32_0 = arith.constant 0 : i32
    return %arg0, %c0_i32 : i32, i32
  }
}

</mosaic_0001>

<bundles_post_ra>
// kernel: _forward.1
= control target key start
LH: loop header
LB: loop body
LE: loop exit
PB: predicated region body
PF: predicated region fallthrough
CT: control target
= control target key end

     0   :  { %v850_v0 = vmov 0.0   ;;  %vm851_vm0 = vmmov 0   ;;  %vm606_vm1 = vcmask 15360   ;;  %s1112_s3 = inlined_call_operand.vmem [shape: bf16[128,128], index: 3, kind: input, shape index: {}]   ;;  %s1113_s2 = inlined_call_operand.vmem [shape: bf16[128,128], index: 2, kind: input, shape index: {}]   ;;  %s1114_s5 = inlined_call_operand.vmem [shape: bf16[128,128], index: 5, kind: input, shape index: {}]   ;;  %s1115_s1 = inlined_call_operand.vmem [shape: f32[16,128], index: 1, kind: input, shape index: {}]   ;;  %s1116_s0 = inlined_call_operand.vmem [shape: f32[16,128], index: 0, kind: input, shape index: {}]   ;;  %s1117_s7 = inlined_call_operand.vmem [shape: bf16[128,128], index: 7, kind: input, shape index: {}]   ;;  %s1118_s4 = inlined_call_operand.vmem [shape: f32[1,128], index: 4, kind: input, shape index: {}]   ;;  %s1119_s9 = inlined_call_operand.vmem [shape: bf16[128,2], index: 9, kind: input, shape index: {}]   ;;  %s1120_s6 = inlined_call_operand.vmem [shape: f32[1,128], index: 6, kind: input, shape index: {}]   ;;  %s1121_s8 = inlined_call_operand.vmem [shape: f32[1,128], index: 8, kind: input, shape index: {}]   ;;  %s1122_s10 = inlined_call_operand.vmem [shape: f32[1,2], index: 10, kind: input, shape index: {}]   ;;  %s1123_s11 = inlined_call_operand.vmem [shape: f32[16,2], index: 11, kind: output, shape index: {}]  }
   0x1   :  { %702 = vmatprep.subr.bf16.mxu0 %v850_v0  ;;  %722 = vmatprep.subr.bf16.mxu1 %v850_v0  ;;  %v804_v1 = vld [vmem:[%s1112_s3 + $0x38] sm:$0xff]   ;;  %v806_v3 = vld [vmem:[%s1112_s3 + $0x30] sm:$0xff]   ;;  %v808_v5 = vld [vmem:[%s1112_s3 + $0x28] sm:$0xff]  }
   0x2   :  { %v805_v2 = vld [vmem:[%s1113_s2 + $0x38] sm:$0xff]   ;;  %718 = vmatprep.mubr.msk.bf16.mxu0 %vm851_vm0, %v850_v0  ;;  %738 = vmatprep.mubr.msk.bf16.mxu1 %vm851_vm0, %v850_v0  ;;  %v807_v4 = vld [vmem:[%s1113_s2 + $0x30] sm:$0xff]   ;;  %v809_v6 = vld [vmem:[%s1113_s2 + $0x28] sm:$0xff]  }
   0x3   :  { %703 = vmatpush3.bf16.msra.mxu0 %v804_v1  ;;  %723 = vmatpush3.bf16.msra.mxu1 %v805_v2  ;;  %v810_v7 = vld [vmem:[%s1112_s3 + $0x20] sm:$0xff]   ;;  %v812_v9 = vld [vmem:[%s1112_s3 + $0x18] sm:$0xff]   ;;  %v814_v11 = vld [vmem:[%s1112_s3 + $0x10] sm:$0xff]  }
   0x4   :  { %704 = vmatprep.subr.bf16.mxu0 %v850_v0  ;;  %724 = vmatprep.subr.bf16.mxu1 %v850_v0  ;;  %v811_v8 = vld [vmem:[%s1113_s2 + $0x20] sm:$0xff]   ;;  %v813_v10 = vld [vmem:[%s1113_s2 + $0x18] sm:$0xff]   ;;  %v815_v12 = vld [vmem:[%s1113_s2 + $0x10] sm:$0xff]  }
   0x5   :  { %v816_v13 = vld [vmem:[%s1112_s3 + $0x8] sm:$0xff]   ;;  %v818_v15 = vld [vmem:[%s1112_s3] sm:$0xff]   ;;  %v820_v23 = vld [vmem:[%s1114_s5 + $0x38] sm:$0xff]  }
   0x6   :  { %v817_v14 = vld [vmem:[%s1113_s2 + $0x8] sm:$0xff]   ;;  %v42_v16 = vld [vmem:[%s1115_s1] sm:$0xff]  ;;  %v821_v24 = vld [vmem:[%s1114_s5 + $0x30] sm:$0xff]  }
   0x7   :  { %705 = vmatpush3.bf16.msra.mxu0 %v806_v3  ;;  %725 = vmatpush3.bf16.msra.mxu1 %v807_v4  ;;  %v43_v17 = vld [vmem:[%s1115_s1 + $0x8] sm:$0xff]  ;;  %v819_v18 = vld [vmem:[%s1113_s2] sm:$0xff]   ;;  %v824_v27 = vld [vmem:[%s1114_s5 + $0x18] sm:$0xff]  }
   0x8   :  { %706 = vmatprep.subr.bf16.mxu0 %v850_v0  ;;  %726 = vmatprep.subr.bf16.mxu1 %v850_v0  ;;  %v39_v19 = vld [vmem:[%s1116_s0] sm:$0xff]  ;;  %v40_v20 = vld [vmem:[%s1116_s0 + $0x8] sm:$0xff]  ;;  %v44_v21 = vpack.c.bf16 %v43_v17, %v42_v16  ;;  %v825_v28 = vld [vmem:[%s1114_s5 + $0x10] sm:$0xff]  }
   0x9   :  { %v41_v22 = vpack.c.bf16 %v40_v20, %v39_v19  ;;  %v822_v25 = vld [vmem:[%s1114_s5 + $0x28] sm:$0xff]   ;;  %v823_v26 = vld [vmem:[%s1114_s5 + $0x20] sm:$0xff]   ;;  %v828_v31 = vld [vmem:[%s1117_s7 + $0x38] sm:$0xff]  }
   0xa   :  { %v826_v29 = vld [vmem:[%s1114_s5 + $0x8] sm:$0xff]   ;;  %v827_v30 = vld [vmem:[%s1114_s5] sm:$0xff]   ;;  %v829_v32 = vld [vmem:[%s1117_s7 + $0x30] sm:$0xff]  }
   0xb   :  { %707 = vmatpush3.bf16.msra.mxu0 %v808_v5  ;;  %727 = vmatpush3.bf16.msra.mxu1 %v809_v6  ;;  %v629_v39 = vld [vmem:[%s1118_s4] ss:$0 sm:$0xff]  ;;  %v830_v48 = vld [vmem:[%s1117_s7 + $0x28] sm:$0xff]   ;;  %v832_v50 = vld [vmem:[%s1117_s7 + $0x18] sm:$0xff]  }
   0xc   :  { %708 = vmatprep.subr.bf16.mxu0 %v850_v0  ;;  %728 = vmatprep.subr.bf16.mxu1 %v850_v0  ;;  %v831_v49 = vld [vmem:[%s1117_s7 + $0x20] sm:$0xff]   ;;  %v833_v51 = vld [vmem:[%s1117_s7 + $0x10] sm:$0xff]   ;;  %v834_v52 = vld [vmem:[%s1117_s7 + $0x8] sm:$0xff]  }
   0xd   :  { %v835_v53 = vld [vmem:[%s1117_s7] sm:$0xff]   ;;  %v836_v54 = vld [vmem:[%s1119_s9 + $0x38] sm:$0xff]   ;;  %v837_v55 = vld [vmem:[%s1119_s9 + $0x30] sm:$0xff]  }
   0xe   :  { %v630_v57 = vld [vmem:[%s1120_s6] ss:$0 sm:$0xff]  ;;  %v838_v2 = vld [vmem:[%s1119_s9 + $0x28] sm:$0xff]   ;;  %v840_v4 = vld [vmem:[%s1119_s9 + $0x18] sm:$0xff]  }
   0xf   :  { %709 = vmatpush3.bf16.msra.mxu0 %v810_v7  ;;  %729 = vmatpush3.bf16.msra.mxu1 %v811_v8  ;;  %v839_v3 = vld [vmem:[%s1119_s9 + $0x20] sm:$0xff]   ;;  %v841_v5 = vld [vmem:[%s1119_s9 + $0x10] sm:$0xff]   ;;  %v842_v6 = vld [vmem:[%s1119_s9 + $0x8] sm:$0xff]  }
  0x10   :  { %710 = vmatprep.subr.bf16.mxu0 %v850_v0  ;;  %730 = vmatprep.subr.bf16.mxu1 %v850_v0  ;;  %v843_v7 = vld [vmem:[%s1119_s9] sm:$0xff]  }
  0x11   :  { %v648_v17 = vld [vmem:[%s1122_s10] ss:$0 sm:$0xff] }
  0x13   :  { %711 = vmatpush3.bf16.msra.mxu0 %v812_v9  ;;  %731 = vmatpush3.bf16.msra.mxu1 %v813_v10  ;;  %v639_v9 = vld [vmem:[%s1121_s8] ss:$0 sm:$0xff] }
  0x14   :  { %712 = vmatprep.subr.bf16.mxu0 %v850_v0  ;;  %732 = vmatprep.subr.bf16.mxu1 %v850_v0 }
  0x17   :  { %713 = vmatpush3.bf16.msra.mxu0 %v814_v11  ;;  %733 = vmatpush3.bf16.msra.mxu1 %v815_v12 }
  0x18   :  { %714 = vmatprep.subr.bf16.mxu0 %v850_v0  ;;  %734 = vmatprep.subr.bf16.mxu1 %v850_v0 }
  0x1b   :  { %715 = vmatpush3.bf16.msra.mxu0 %v816_v13  ;;  %735 = vmatpush3.bf16.msra.mxu1 %v817_v14 }
  0x1c   :  { %716 = vmatprep.subr.bf16.mxu0 %v850_v0  ;;  %736 = vmatprep.subr.bf16.mxu1 %v850_v0 }
  0x1f   :  { %717 = vmatpush3.bf16.msra.mxu0 %v818_v15  ;;  %737 = vmatpush3.bf16.msra.mxu1 %v819_v18 }
  0x20   :  { %742 = vmatprep.subr.bf16.mxu0 %v850_v0  ;;  %762 = vmatprep.subr.bf16.mxu1 %v850_v0 }
  0x22   :  { %719 = vmatmul.mubr.bf16.vlgmr.msra.gmra.mxu0 %v44_v21  ;;  %739 = vmatmul.mubr.bf16.vlgmr.msra.gmra.mxu1 %v41_v22 }
  0x23   :  { %743 = vmatpush3.bf16.msra.mxu0 %v820_v23  ;;  %758 = vmatprep.mubr.msk.bf16.mxu0 %vm851_vm0, %v850_v0 }
  0x24   :  { %744 = vmatprep.subr.bf16.mxu0 %v850_v0  ;;  %778 = vmatprep.mubr.msk.bf16.mxu1 %vm851_vm0, %v850_v0 }
  0x25   :  { %763 = vmatpush3.bf16.msra.mxu1 %v828_v31 }
  0x26   :  { %764 = vmatprep.subr.bf16.mxu1 %v850_v0 }
  0x27   :  { %745 = vmatpush3.bf16.msra.mxu0 %v821_v24 }
  0x28   :  { %746 = vmatprep.subr.bf16.mxu0 %v850_v0 }
  0x29   :  { %765 = vmatpush3.bf16.msra.mxu1 %v829_v32 }
  0x2a   :  { %766 = vmatprep.subr.bf16.mxu1 %v850_v0 }
  0x2b   :  { %747 = vmatpush3.bf16.msra.mxu0 %v822_v25 }
  0x2c   :  { %748 = vmatprep.subr.bf16.mxu0 %v850_v0 }
  0x2d   :  { %767 = vmatpush3.bf16.msra.mxu1 %v830_v48 }
  0x2e   :  { %768 = vmatprep.subr.bf16.mxu1 %v850_v0 }
  0x2f   :  { %749 = vmatpush3.bf16.msra.mxu0 %v823_v26 }
  0x30   :  { %750 = vmatprep.subr.bf16.mxu0 %v850_v0 }
  0x31   :  { %769 = vmatpush3.bf16.msra.mxu1 %v831_v49 }
  0x32   :  { %770 = vmatprep.subr.bf16.mxu1 %v850_v0 }
  0x33   :  { %751 = vmatpush3.bf16.msra.mxu0 %v824_v27 }
  0x34   :  { %752 = vmatprep.subr.bf16.mxu0 %v850_v0 }
  0x35   :  { %771 = vmatpush3.bf16.msra.mxu1 %v832_v50 }
  0x36   :  { %772 = vmatprep.subr.bf16.mxu1 %v850_v0 }
  0x37   :  { %753 = vmatpush3.bf16.msra.mxu0 %v825_v28 }
  0x38   :  { %754 = vmatprep.subr.bf16.mxu0 %v850_v0 }
  0x39   :  { %773 = vmatpush3.bf16.msra.mxu1 %v833_v51 }
  0x3a   :  { %774 = vmatprep.subr.bf16.mxu1 %v850_v0 }
  0x3b   :  { %755 = vmatpush3.bf16.msra.mxu0 %v826_v29 }
  0x3c   :  { %756 = vmatprep.subr.bf16.mxu0 %v850_v0 }
  0x3d   :  { %775 = vmatpush3.bf16.msra.mxu1 %v834_v52 }
  0x3e   :  { %776 = vmatprep.subr.bf16.mxu1 %v850_v0 }
  0x3f   :  { %757 = vmatpush3.bf16.msra.mxu0 %v827_v30 }
  0x40   :  { %782 = vmatprep.subr.bf16.mxu0 %v850_v0 }
  0x41   :  { %777 = vmatpush3.bf16.msra.mxu1 %v835_v53 }
  0xe2   :  { %v159_v33 = vpop.f32.mrf.mxu0  ;;  %v248_v34 = vpop.f32.mrf.mxu1 }
  0xe3   :  { %v249_v37 = vadd.f32 %v248_v34, %v159_v33 }
  0xe4   :  { %v720_v35 = vpop.f32.mrf.mxu0  ;;  %v740_v36 = vpop.f32.mrf.mxu1 }
  0xe5   :  { %v262_v44 = vadd.f32 %v629_v39, %v249_v37 }
  0xe6   :  { %v162_v38 = vpop.f32.mrf.mxu0  ;;  %v251_v40 = vpop.f32.mrf.mxu1 }
  0xe7   :  { %v252_v41 = vadd.f32 %v251_v40, %v162_v38 }
  0xe8   :  { %v721_v42 = vpop.f32.mrf.mxu0  ;;  %v741_v43 = vpop.f32.mrf.mxu1 }
  0xe9   :  { %v263_v45 = vadd.f32 %v629_v39, %v252_v41 }
  0xeb   :  { %v264_v46 = vpack.c.bf16 %v263_v45, %v262_v44 }
  0xed   :  { %844 = vtanh.bf16 %v264_v46 }
  0xfb   :  { %v845_v47 = vpop.eup %844 }
  0xfc   :  { %759 = vmatmul.mubr.bf16.vlgmr.msra.gmra.mxu0 %v845_v47 }
  0xfd   :  { %798 = vmatprep.mubr.msk.bf16.mxu0 %vm851_vm0, %v850_v0  ;;  %783 = vmatpush3.bf16.msra.mxu0 %v836_v54 }
  0xfe   :  { %784 = vmatprep.subr.bf16.mxu0 %v850_v0 }
 0x101   :  { %785 = vmatpush3.bf16.msra.mxu0 %v837_v55 }
 0x102   :  { %786 = vmatprep.subr.bf16.mxu0 %v850_v0 }
 0x105   :  { %787 = vmatpush3.bf16.msra.mxu0 %v838_v2 }
 0x106   :  { %788 = vmatprep.subr.bf16.mxu0 %v850_v0 }
 0x109   :  { %789 = vmatpush3.bf16.msra.mxu0 %v839_v3 }
 0x10a   :  { %790 = vmatprep.subr.bf16.mxu0 %v850_v0 }
 0x10d   :  { %791 = vmatpush3.bf16.msra.mxu0 %v840_v4 }
 0x10e   :  { %792 = vmatprep.subr.bf16.mxu0 %v850_v0 }
 0x111   :  { %793 = vmatpush3.bf16.msra.mxu0 %v841_v5 }
 0x112   :  { %794 = vmatprep.subr.bf16.mxu0 %v850_v0 }
 0x115   :  { %795 = vmatpush3.bf16.msra.mxu0 %v842_v6 }
 0x116   :  { %796 = vmatprep.subr.bf16.mxu0 %v850_v0 }
 0x119   :  { %797 = vmatpush3.bf16.msra.mxu0 %v843_v7 }
 0x1bc   :  { %v371_v56 = vpop.f32.mrf.mxu0 }
 0x1bd   :  { %v372_v60 = vadd.f32 %v630_v57, %v371_v56 }
 0x1be   :  { %v760_v58 = vpop.f32.mrf.mxu0 }
 0x1c0   :  { %v374_v59 = vpop.f32.mrf.mxu0 }
 0x1c1   :  { %v375_v61 = vadd.f32 %v630_v57, %v374_v59 }
 0x1c2   :  { %v761_v62 = vpop.f32.mrf.mxu0 }
 0x1c3   :  { %v378_v63 = vpack.c.bf16 %v375_v61, %v372_v60 }
 0x1c5   :  { %846 = vtanh.bf16 %v378_v63 }
 0x1d3   :  { %v847_v1 = vpop.eup %846 }
 0x1d4   :  { %779 = vmatmul.mubr.bf16.vlgmr.msra.gmra.mxu1 %v847_v1 }
 0x294   :  { %v485_v8 = vpop.f32.mrf.mxu1 }
 0x295   :  { %v486_v12 = vadd.f32 %v639_v9, %v485_v8 }
 0x296   :  { %v780_v10 = vpop.f32.mrf.mxu1 }
 0x298   :  { %v488_v11 = vpop.f32.mrf.mxu1 }
 0x299   :  { %v489_v13 = vadd.f32 %v639_v9, %v488_v11 }
 0x29a   :  { %v781_v14 = vpop.f32.mrf.mxu1 }
 0x29b   :  { %v492_v15 = vpack.c.bf16 %v489_v13, %v486_v12 }
 0x29d   :  { %848 = vtanh.bf16 %v492_v15 }
 0x2ab   :  { %v849_v16 = vpop.eup %848 }
 0x2ac   :  { %799 = vmatmul.mubr.bf16.vlgmr.msra.gmra.mxu0 %v849_v16 }
 0x36c   :  { %v599_v0 = vpop.f32.mrf.mxu0 }
 0x36d   :  { %v600_v18 = vadd.f32 %v648_v17, %v599_v0 }
 0x36e   :  { %v800_v19 = vpop.f32.mrf.mxu0 }
 0x36f   :  { %607 = vst.msk [vmem:[%s1123_s11] sm:$0xff] %vm606_vm1, %v600_v18 }
 0x370   :  { %v602_v20 = vpop.f32.mrf.mxu0 }
 0x371   :  { %v603_v21 = vadd.f32 %v648_v17, %v602_v20 }
 0x372   :  { %v801_v22 = vpop.f32.mrf.mxu0 }
 0x373   :  { %608 = vst.msk [vmem:[%s1123_s11 + $0x8] sm:$0xff] %vm606_vm1, %v603_v21 }

</bundles_post_ra>
